<compile_context>
chip_gen: v7x
topology: tpu7x:2x2x1
jax: 0.10.0
libtpu: 0.0.40
codegen_flags: <defaults>
</compile_context>

<pallas_src>
import functools

import numpy as np
import jax
import jax.numpy as jnp
from jax.scipy.special import erf as _jax_erf
from jax.experimental import pallas as pl
from jax.experimental.pallas import tpu as pltpu

_LANE = 128


# --------------------------------------------------------------------------
# In-kernel helpers
# --------------------------------------------------------------------------
def _erf_approx(x):
    # Abramowitz & Stegun 7.1.26, max abs error ~1.5e-7 (float32-level).
    # TODO(synk): switch to lax.erf if/when Mosaic gains an erf lowering rule.
    p = 0.3275911
    a1, a2, a3, a4, a5 = (0.254829592, -0.284496736, 1.421413741,
                          -1.453152027, 1.061405429)
    ax = jnp.abs(x)
    d = 1.0 + p * ax
    t0 = pl.reciprocal(d, approx=True)      # EUP rcp (free slot)
    t = t0 * (2.0 - d * t0)                 # one Newton step -> f32-accurate
    poly = ((((a5 * t + a4) * t + a3) * t + a2) * t + a1) * t
    y = 1.0 - poly * jnp.exp(-ax * ax)
    return jnp.where(x >= 0, y, -y)


def _rowsum8(x):
    """(TS,128) -> (8,128): sum sublane groups of 8 with plain VPU adds."""
    ts = x.shape[0]
    r = x[0:8, :]
    for i in range(1, ts // 8):
        r = r + x[i * 8:(i + 1) * 8, :]
    return r


def _sum11(x):
    """(8,128) -> (1,1) full reduction (lane reduce then sublane reduce)."""
    return jnp.sum(jnp.sum(x, axis=1, keepdims=True), axis=0, keepdims=True)


# --------------------------------------------------------------------------
# Fused kernel: grid = (batch b, phase c, pixel tile n)
# --------------------------------------------------------------------------
def _fused_kernel(geom_ref,      # SMEM (B, 3+8G) per-image scalars (prefetch)
                  grids_ref,     # VMEM (3, S_pad, 128) gx / gy / gr, resident
                  out_ref,       # VMEM (1, TS, 128) image tile
                  cache_ref,     # VMEM (1+G, S_pad, 128) per-image term cache
                  acc_ref,       # VMEM (1+G, 8, 128) per-image partial sums
                  *, n_gaussian, disk_coef, eps, ts):
    G = n_gaussian
    b = pl.program_id(0)
    c = pl.program_id(1)          # 0: terms + sums, 1: weighted render
    n = pl.program_id(2)
    off = pl.multiple_of(n * ts, 8)

    @pl.when(jnp.logical_and(c == 0, n == 0))
    def _init():
        acc_ref[...] = jnp.zeros_like(acc_ref)

    @pl.when(c == 0)
    def _phase_terms():
        gx = grids_ref[0, pl.ds(off, ts), :]
        gy = grids_ref[1, pl.ds(off, ts), :]
        gr = grids_ref[2, pl.ds(off, ts), :]

        r = geom_ref[b, 0]
        disk = 0.5 * (1.0 + _erf_approx((r - gr) * disk_coef))
        cache_ref[0, pl.ds(off, ts), :] = disk
        acc_ref[0, :, :] = acc_ref[0, :, :] + _rowsum8(disk)

        for k in range(G):
            col = 3 + 8 * k
            x_s = geom_ref[b, col + 0]
            y_s = geom_ref[b, col + 1]
            ct = geom_ref[b, col + 2]
            st = geom_ref[b, col + 3]
            i2x = geom_ref[b, col + 4]
            i2y = geom_ref[b, col + 5]
            xc = gx - x_s
            yc = gy - y_s
            xr = xc * ct + yc * st
            yr = yc * ct - xc * st
            g = jnp.exp(-(i2x * xr * xr + i2y * yr * yr))
            cache_ref[1 + k, pl.ds(off, ts), :] = g
            acc_ref[1 + k, :, :] = acc_ref[1 + k, :, :] + _rowsum8(g)

    @pl.when(c == 1)
    def _phase_render():
        # Per-image weight folding (tiny (1,1) math, recomputed per tile so no
        # scalar stores are needed; acc_ref persists across grid steps).
        cflux = geom_ref[b, 1]
        tflux = geom_ref[b, 2]
        s_disk = _sum11(acc_ref[0, :, :])                     # (1,1)
        inv_disk = 1.0 / (s_disk + eps)
        cres_sum = (cflux * s_disk) * inv_disk
        gws = []
        for k in range(G):
            col = 3 + 8 * k
            scale = geom_ref[b, col + 6]
            amp = geom_ref[b, col + 7]                        # 1/(2*pi*sx*sy)
            s_nu = amp * _sum11(acc_ref[1 + k, :, :])
            inv_nu = 1.0 / (s_nu + eps)
            cres_sum = cres_sum + (scale * s_nu) * inv_nu
            gws.append(scale * (amp * inv_nu))
        inv_c = 1.0 / (cres_sum + eps)

        w_disk = tflux * (cflux * inv_disk) * inv_c           # (1,1)
        img = w_disk * cache_ref[0, pl.ds(off, ts), :]
        for k in range(G):
            w_k = tflux * gws[k] * inv_c
            img = img + w_k * cache_ref[1 + k, pl.ds(off, ts), :]
        out_ref[0, :, :] = img


# --------------------------------------------------------------------------
# Model wrapper
# --------------------------------------------------------------------------
class NuisanceFloorParam2Img:
    def __init__(self, npix, n_gaussian=1, fov=160, r_range=(10.0, 40.0),
                 flux_range=(0.8, 1.2), crescent_flux_range=(0.001, 2.0),
                 shift_range=(-200.0, 200.0), sigma_range=(1.0, 100.0),
                 gaussian_scale_range=(0.001, 2.0), flux_flag=False):
        self.npix = npix
        self.n_gaussian = n_gaussian
        self.fov = fov
        self.r_range = r_range
        self.flux_range = flux_range
        self.crescent_flux_range = crescent_flux_range
        self.shift_range = shift_range
        self.sigma_range = sigma_range
        self.gaussian_scale_range = gaussian_scale_range
        self.flux_flag = flux_flag
        self.nparams = (1 if flux_flag else 0) + 6 * n_gaussian + 2
        self.eps = 1e-4

        # ---- image grid (matches torch.meshgrid(-xs, xs), 'ij' indexing) ----
        gap = 1.0 / npix
        xs = -1.0 + gap + 2.0 * gap * np.arange(npix)
        gx = np.broadcast_to(xs[None, :], (npix, npix)).astype(np.float64)
        gy = np.broadcast_to(-xs[:, None], (npix, npix)).astype(np.float64)
        gr = np.sqrt(gx ** 2 + gy ** 2)
        self.grid_x2d = jnp.asarray(gx, jnp.float32)
        self.grid_y2d = jnp.asarray(gy, jnp.float32)
        self.grid_r2d = jnp.asarray(gr, jnp.float32)

        # ---- pixel tiling: sublane x lane = (TS, 128), TS multiple of 8 ----
        N = npix * npix
        S = -(-N // _LANE)                       # sublane rows of 128 pixels
        n_tiles = max(1, -(-S // 256))           # <=256 rows per tile (128 KiB)
        ts = -(-S // n_tiles)
        ts = ((ts + 7) // 8) * 8
        S_pad = n_tiles * ts
        self._ts, self._s_pad, self._n_tiles = ts, S_pad, n_tiles

        # pad with huge coordinates so padded pixels contribute exactly 0
        # to the disk (erf -> -1) and to every gaussian (exp -> 0).
        BIG = 1.0e6

        def _padflat(a):
            flat = np.asarray(a, np.float32).reshape(-1)
            pad = np.full(S_pad * _LANE - N, BIG, np.float32)
            return np.concatenate([flat, pad])

        self.grids = jnp.asarray(
            np.stack([_padflat(gx), _padflat(gy), _padflat(gr)], axis=0)
            .reshape(3, S_pad, _LANE))                       # (3, S_pad, 128)

        # disk smoothing sigma = 10 / (0.5*fov); kernels get 1/(sqrt(2)*sigma)
        self._disk_sigma = 10.0 / (0.5 * fov)
        self._disk_coef = float(1.0 / (np.sqrt(2.0) * self._disk_sigma))

        self._forward = jax.jit(self._forward_impl)

    # ---- feature scaling (tiny per-image scalar math, stays in JAX glue) ----
    def _features(self, params):
        half = 0.5 * self.fov
        G = self.n_gaussian
        r = (self.r_range[0] / half
             + params[:, 0] * (self.r_range[1] - self.r_range[0]) / half)
        xs, ys, sc, sx, sy, th = [], [], [], [], [], []
        theta_coef = (181.0 / 180.0) * 0.5 * float(np.pi)
        for k in range(G):
            xs.append(self.shift_range[0] / half + params[:, 1 + 6 * k]
                      * (self.shift_range[1] - self.shift_range[0]) / half)
            ys.append(self.shift_range[0] / half + params[:, 2 + 6 * k]
                      * (self.shift_range[1] - self.shift_range[0]) / half)
            sc.append(self.gaussian_scale_range[0] + params[:, 3 + 6 * k]
                      * (self.gaussian_scale_range[1] - self.gaussian_scale_range[0]))
            sx.append(self.sigma_range[0] / half + params[:, 4 + 6 * k]
                      * (self.sigma_range[1] - self.sigma_range[0]) / half)
            sy.append(self.sigma_range[0] / half + params[:, 5 + 6 * k]
                      * (self.sigma_range[1] - self.sigma_range[0]) / half)
            th.append(theta_coef * params[:, 6 + 6 * k])
        if self.flux_flag:
            total_flux = (self.flux_range[0]
                          + (self.flux_range[1] - self.flux_range[0])
                          * params[:, 1 + 6 * G])
            crescent_flux = (self.crescent_flux_range[0]
                             + (self.crescent_flux_range[1] - self.crescent_flux_range[0])
                             * params[:, 2 + 6 * G])
        else:
            total_flux = None
            crescent_flux = (self.crescent_flux_range[0]
                             + (self.crescent_flux_range[1] - self.crescent_flux_range[0])
                             * params[:, 1 + 6 * G])
        stack = lambda lst: jnp.stack(lst, axis=1)            # (B, G)
        return dict(r=r, crescent_flux=crescent_flux, total_flux=total_flux,
                    x_shift=stack(xs), y_shift=stack(ys), scale=stack(sc),
                    sigma_x=stack(sx), sigma_y=stack(sy), theta=stack(th))

    # ---- forward via the fused Pallas kernel ----
    def _forward_impl(self, params):
        params = params.astype(jnp.float32)
        B = params.shape[0]
        npix, G = self.npix, self.n_gaussian
        N = npix * npix
        ts, S_pad, n_tiles = self._ts, self._s_pad, self._n_tiles

        f = self._features(params)
        # per-image scalars (trig / reciprocals / amplitudes hoisted out of the kernel)
        cos_t = jnp.cos(f['theta'])                           # (B, G)
        sin_t = jnp.sin(f['theta'])
        i2x = 0.5 / (f['sigma_x'] * f['sigma_x'])
        i2y = 0.5 / (f['sigma_y'] * f['sigma_y'])
        amp = 1.0 / (2.0 * np.pi * f['sigma_x'] * f['sigma_y'])
        tflux = (f['total_flux'] if self.flux_flag
                 else jnp.ones((B,), jnp.float32))
        cols = [f['r'][:, None], f['crescent_flux'][:, None], tflux[:, None]]
        for k in range(G):
            cols += [f['x_shift'][:, k:k + 1], f['y_shift'][:, k:k + 1],
                     cos_t[:, k:k + 1], sin_t[:, k:k + 1],
                     i2x[:, k:k + 1], i2y[:, k:k + 1],
                     f['scale'][:, k:k + 1], amp[:, k:k + 1]]
        geom = jnp.concatenate(cols, axis=1)                  # (B, 3+8G)
        Fg = geom.shape[1]

        kernel = functools.partial(_fused_kernel, n_gaussian=G,
                                   disk_coef=self._disk_coef,
                                   eps=self.eps, ts=ts)

        # VMEM budget: resident grids (x2 pipeline buffers) + per-image cache
        # + per-tile temporaries; capped at v7x's 64 MiB physical VMEM.
        vmem_need = ((2 * 3 + (1 + G)) * S_pad * _LANE * 4
                     + 24 * ts * _LANE * 4 + (1 << 20))
        vmem_limit = int(min(64 * 1024 * 1024,
                             max(32 * 1024 * 1024, vmem_need)))

        grid_spec = pltpu.PrefetchScalarGridSpec(
            num_scalar_prefetch=1,                            # geom -> SMEM
            grid=(B, 2, n_tiles),
            in_specs=[
                # full grids resident in VMEM, fetched from HBM once per call
                pl.BlockSpec((3, S_pad, _LANE), lambda b, c, n, _g: (0, 0, 0)),
            ],
            # phase 0 pins the output index (nothing written); phase 1 walks n
            out_specs=pl.BlockSpec((1, ts, _LANE),
                                   lambda b, c, n, _g: (b, n * c, 0)),
            scratch_shapes=[
                pltpu.VMEM((1 + G, S_pad, _LANE), jnp.float32),   # term cache
                pltpu.VMEM((1 + G, 8, _LANE), jnp.float32),       # partial sums
            ],
        )

        out = pl.pallas_call(
            kernel,
            out_shape=jax.ShapeDtypeStruct((B, S_pad, _LANE), jnp.float32),
            grid_spec=grid_spec,
            compiler_params=pltpu.CompilerParams(
                dimension_semantics=("parallel", "arbitrary", "arbitrary"),
                vmem_limit_bytes=vmem_limit),
            cost_estimate=pl.CostEstimate(
                flops=B * S_pad * _LANE * (50 + 30 * G),
                transcendentals=B * S_pad * _LANE * (2 + G),
                bytes_accessed=4 * (3 * S_pad * _LANE
                                    + B * S_pad * _LANE + B * Fg)),
        )(geom, self.grids)

        return out.reshape(B, S_pad * _LANE)[:, :N].reshape(B, npix, npix)

    def __call__(self, params):
        return self._forward(params)

    # ---- pure-JAX reference (mirrors the PyTorch forward op-for-op) ----
    def reference(self, params):
        params = params.astype(jnp.float32)
        f = self._features(params)
        G = self.n_gaussian
        eps = self.eps
        r = f['r'][:, None, None]
        sigma = self._disk_sigma
        gx, gy, gr = self.grid_x2d, self.grid_y2d, self.grid_r2d
        disk = 0.5 * (1.0 + _jax_erf((r - gr) / (np.sqrt(2.0) * sigma)))
        disk = disk / (jnp.sum(disk, axis=(-1, -2))[:, None, None] + eps)
        crescent = f['crescent_flux'][:, None, None] * disk
        for k in range(G):
            xs = f['x_shift'][:, k][:, None, None]
            ys = f['y_shift'][:, k][:, None, None]
            sx = f['sigma_x'][:, k][:, None, None]
            sy = f['sigma_y'][:, k][:, None, None]
            th = f['theta'][:, k][:, None, None]
            xc = gx - xs
            yc = gy - ys
            xr = xc * jnp.cos(th) + yc * jnp.sin(th)
            yr = -xc * jnp.sin(th) + yc * jnp.cos(th)
            delta = 0.5 * (xr ** 2 / sx ** 2 + yr ** 2 / sy ** 2)
            nu = 1.0 / (2.0 * np.pi * sx * sy) * jnp.exp(-delta)
            nu = nu / (jnp.sum(nu, axis=(-1, -2))[:, None, None] + eps)
            crescent = crescent + f['scale'][:, k][:, None, None] * nu
        denom = jnp.sum(crescent, axis=(-1, -2))[:, None, None] + eps
        if self.flux_flag:
            crescent = f['total_flux'][:, None, None] * crescent / denom
        else:
            crescent = crescent / denom
        return crescent


if __name__ == "__main__":
    npix = 16
    n_gaussian = 1
    B = 2

    model = NuisanceFloorParam2Img(npix=npix, n_gaussian=n_gaussian)

    key = jax.random.PRNGKey(0)
    params = jax.random.uniform(key, (B, model.nparams), dtype=jnp.float32)

    out = jax.block_until_ready(model(params))
    ref = jax.block_until_ready(model.reference(params))

    np.testing.assert_allclose(np.asarray(out), np.asarray(ref),
                               rtol=2e-4, atol=1e-6)
    assert out.shape == (B, npix, npix)
    print("KERNEL_OK")
</pallas_src>

<mosaic_0001>
module attributes {stable_mosaic.version = 11 : i64} {
  func.func @_fused_kernel(%arg0: i32, %arg1: i32, %arg2: i32, %arg3: memref<2x11xf32, #tpu.memory_space<smem>>, %arg4: memref<3x8x128xf32, #tpu.memory_space<vmem>>, %arg5: memref<1x8x128xf32, #tpu.memory_space<vmem>>, %arg6: memref<2x8x128xf32, #tpu.memory_space<vmem>>, %arg7: memref<2x8x128xf32, #tpu.memory_space<vmem>>) attributes {dimension_semantics = [#tpu.dimension_semantics<parallel>, #tpu.dimension_semantics<arbitrary>, #tpu.dimension_semantics<arbitrary>], iteration_bounds = array<i64: 2, 2, 1>, scalar_prefetch = 1 : i64, scratch_operands = 2 : i64, tpu.core_type = #tpu.core_type<tc>, window_params = [{pipeline_mode = #tpu.pipeline_mode<synchronous>, transform_indices = @transform_0, window_bounds = array<i64: 3, 8, 128>}, {transform_indices = @transform_1, window_bounds = array<i64: 1, 8, 128>}]} {
    %c8_i32 = arith.constant 8 : i32
    %0 = arith.muli %arg2, %c8_i32 : i32
    %1 = tpu.assume_multiple %0, 8 : i32
    %c0_i32 = arith.constant 0 : i32
    %2 = arith.cmpi eq, %arg1, %c0_i32 : i32
    %c0_i32_0 = arith.constant 0 : i32
    %3 = arith.cmpi eq, %arg2, %c0_i32_0 : i32
    %4 = arith.andi %2, %3 : i1
    %5 = arith.extui %4 : i1 to i32
    %c0_i32_1 = arith.constant 0 : i32
    %6 = arith.cmpi ne, %5, %c0_i32_1 : i32
    scf.if %6 {
      %cst = arith.constant 0.000000e+00 : f32
      %13 = vector.broadcast %cst : f32 to vector<2x8x128xf32>
      %c0 = arith.constant 0 : index
      %c0_5 = arith.constant 0 : index
      %c0_6 = arith.constant 0 : index
      %14 = vector.load %arg7[%c0, %c0_5, %c0_6] : memref<2x8x128xf32, #tpu.memory_space<vmem>>, vector<2x8x128xf32>
      tpu.vector_store %arg7[%c0, %c0_5, %c0_6], %13 {strides = array<i32>} : memref<2x8x128xf32, #tpu.memory_space<vmem>>, vector<2x8x128xf32>,
    } else {
    }
    %c0_i32_2 = arith.constant 0 : i32
    %7 = arith.cmpi eq, %arg1, %c0_i32_2 : i32
    %8 = arith.extui %7 : i1 to i32
    %c0_i32_3 = arith.constant 0 : i32
    %9 = arith.cmpi ne, %8, %c0_i32_3 : i32
    scf.if %9 {
      %c0 = arith.constant 0 : index
      %13 = arith.index_cast %1 : i32 to index
      %c0_5 = arith.constant 0 : index
      %14 = vector.load %arg4[%c0, %13, %c0_5] : memref<3x8x128xf32, #tpu.memory_space<vmem>>, vector<1x8x128xf32>
      %15 = vector.shape_cast %14 : vector<1x8x128xf32> to vector<8x128xf32>
      %c1 = arith.constant 1 : index
      %16 = arith.index_cast %1 : i32 to index
      %c0_6 = arith.constant 0 : index
      %17 = vector.load %arg4[%c1, %16, %c0_6] : memref<3x8x128xf32, #tpu.memory_space<vmem>>, vector<1x8x128xf32>
      %18 = vector.shape_cast %17 : vector<1x8x128xf32> to vector<8x128xf32>
      %c2 = arith.constant 2 : index
      %19 = arith.index_cast %1 : i32 to index
      %c0_7 = arith.constant 0 : index
      %20 = vector.load %arg4[%c2, %19, %c0_7] : memref<3x8x128xf32, #tpu.memory_space<vmem>>, vector<1x8x128xf32>
      %21 = vector.shape_cast %20 : vector<1x8x128xf32> to vector<8x128xf32>
      %22 = arith.index_cast %arg0 : i32 to index
      %c0_8 = arith.constant 0 : index
      %23 = memref.load %arg3[%22, %c0_8] : memref<2x11xf32, #tpu.memory_space<smem>>
      %24 = vector.broadcast %23 : f32 to vector<8x128xf32>
      %25 = arith.subf %24, %21 : vector<8x128xf32>
      %cst = arith.constant 5.65685415 : f32
      %26 = vector.broadcast %cst : f32 to vector<8x128xf32>
      %27 = arith.mulf %25, %26 : vector<8x128xf32>
      %28 = math.absf %27 : vector<8x128xf32>
      %cst_9 = arith.constant 0.327591091 : f32
      %29 = vector.broadcast %cst_9 : f32 to vector<8x128xf32>
      %30 = arith.mulf %29, %28 : vector<8x128xf32>
      %cst_10 = arith.constant 1.000000e+00 : f32
      %31 = vector.broadcast %cst_10 : f32 to vector<8x128xf32>
      %32 = arith.addf %31, %30 : vector<8x128xf32>
      %33 = tpu.reciprocal %32 {approx = true} : vector<8x128xf32> -> vector<8x128xf32>
      %34 = arith.mulf %32, %33 : vector<8x128xf32>
      %cst_11 = arith.constant 2.000000e+00 : f32
      %35 = vector.broadcast %cst_11 : f32 to vector<8x128xf32>
      %36 = arith.subf %35, %34 : vector<8x128xf32>
      %37 = arith.mulf %33, %36 : vector<8x128xf32>
      %cst_12 = arith.constant 1.06140542 : f32
      %38 = vector.broadcast %cst_12 : f32 to vector<8x128xf32>
      %39 = arith.mulf %38, %37 : vector<8x128xf32>
      %cst_13 = arith.constant -1.45315206 : f32
      %40 = vector.broadcast %cst_13 : f32 to vector<8x128xf32>
      %41 = arith.addf %39, %40 : vector<8x128xf32>
      %42 = arith.mulf %41, %37 : vector<8x128xf32>
      %cst_14 = arith.constant 1.42141378 : f32
      %43 = vector.broadcast %cst_14 : f32 to vector<8x128xf32>
      %44 = arith.addf %42, %43 : vector<8x128xf32>
      %45 = arith.mulf %44, %37 : vector<8x128xf32>
      %cst_15 = arith.constant -0.284496725 : f32
      %46 = vector.broadcast %cst_15 : f32 to vector<8x128xf32>
      %47 = arith.addf %45, %46 : vector<8x128xf32>
      %48 = arith.mulf %47, %37 : vector<8x128xf32>
      %cst_16 = arith.constant 0.254829586 : f32
      %49 = vector.broadcast %cst_16 : f32 to vector<8x128xf32>
      %50 = arith.addf %48, %49 : vector<8x128xf32>
      %51 = arith.mulf %50, %37 : vector<8x128xf32>
      %cst_17 = arith.constant 0.000000e+00 : f32
      %52 = vector.broadcast %cst_17 : f32 to vector<8x128xf32>
      %53 = arith.subf %52, %28 : vector<8x128xf32>
      %54 = arith.mulf %53, %28 : vector<8x128xf32>
      %55 = math.exp %54 : vector<8x128xf32>
      %56 = arith.mulf %51, %55 : vector<8x128xf32>
      %cst_18 = arith.constant 1.000000e+00 : f32
      %57 = vector.broadcast %cst_18 : f32 to vector<8x128xf32>
      %58 = arith.subf %57, %56 : vector<8x128xf32>
      %cst_19 = arith.constant 0.000000e+00 : f32
      %59 = vector.broadcast %cst_19 : f32 to vector<8x128xf32>
      %60 = arith.cmpf oge, %27, %59 : vector<8x128xf32>
      %cst_20 = arith.constant 0.000000e+00 : f32
      %61 = vector.broadcast %cst_20 : f32 to vector<8x128xf32>
      %62 = arith.subf %61, %58 : vector<8x128xf32>
      %63 = arith.select %60, %58, %62 : vector<8x128xi1>, vector<8x128xf32>
      %cst_21 = arith.constant 1.000000e+00 : f32
      %64 = vector.broadcast %cst_21 : f32 to vector<8x128xf32>
      %65 = arith.addf %64, %63 : vector<8x128xf32>
      %cst_22 = arith.constant 5.000000e-01 : f32
      %66 = vector.broadcast %cst_22 : f32 to vector<8x128xf32>
      %67 = arith.mulf %66, %65 : vector<8x128xf32>
      %c0_23 = arith.constant 0 : index
      %68 = arith.index_cast %1 : i32 to index
      %c0_24 = arith.constant 0 : index
      %69 = vector.load %arg6[%c0_23, %68, %c0_24] : memref<2x8x128xf32, #tpu.memory_space<vmem>>, vector<1x8x128xf32>
      %70 = vector.shape_cast %69 : vector<1x8x128xf32> to vector<8x128xf32>
      %71 = vector.shape_cast %67 : vector<8x128xf32> to vector<1x8x128xf32>
      tpu.vector_store %arg6[%c0_23, %68, %c0_24], %71 {strides = array<i32>} : memref<2x8x128xf32, #tpu.memory_space<vmem>>, vector<1x8x128xf32>,
      %c0_25 = arith.constant 0 : index
      %c0_26 = arith.constant 0 : index
      %c0_27 = arith.constant 0 : index
      %72 = vector.load %arg7[%c0_25, %c0_26, %c0_27] : memref<2x8x128xf32, #tpu.memory_space<vmem>>, vector<1x8x128xf32>
      %73 = vector.shape_cast %72 : vector<1x8x128xf32> to vector<8x128xf32>
      %74 = arith.addf %73, %67 : vector<8x128xf32>
      %c0_28 = arith.constant 0 : index
      %c0_29 = arith.constant 0 : index
      %c0_30 = arith.constant 0 : index
      %75 = vector.load %arg7[%c0_28, %c0_29, %c0_30] : memref<2x8x128xf32, #tpu.memory_space<vmem>>, vector<1x8x128xf32>
      %76 = vector.shape_cast %75 : vector<1x8x128xf32> to vector<8x128xf32>
      %77 = vector.shape_cast %74 : vector<8x128xf32> to vector<1x8x128xf32>
      tpu.vector_store %arg7[%c0_28, %c0_29, %c0_30], %77 {strides = array<i32>} : memref<2x8x128xf32, #tpu.memory_space<vmem>>, vector<1x8x128xf32>,
      %78 = arith.index_cast %arg0 : i32 to index
      %c3 = arith.constant 3 : index
      %79 = memref.load %arg3[%78, %c3] : memref<2x11xf32, #tpu.memory_space<smem>>
      %80 = arith.index_cast %arg0 : i32 to index
      %c4 = arith.constant 4 : index
      %81 = memref.load %arg3[%80, %c4] : memref<2x11xf32, #tpu.memory_space<smem>>
      %82 = arith.index_cast %arg0 : i32 to index
      %c5 = arith.constant 5 : index
      %83 = memref.load %arg3[%82, %c5] : memref<2x11xf32, #tpu.memory_space<smem>>
      %84 = arith.index_cast %arg0 : i32 to index
      %c6 = arith.constant 6 : index
      %85 = memref.load %arg3[%84, %c6] : memref<2x11xf32, #tpu.memory_space<smem>>
      %86 = arith.index_cast %arg0 : i32 to index
      %c7 = arith.constant 7 : index
      %87 = memref.load %arg3[%86, %c7] : memref<2x11xf32, #tpu.memory_space<smem>>
      %88 = arith.index_cast %arg0 : i32 to index
      %c8 = arith.constant 8 : index
      %89 = memref.load %arg3[%88, %c8] : memref<2x11xf32, #tpu.memory_space<smem>>
      %90 = vector.broadcast %79 : f32 to vector<8x128xf32>
      %91 = arith.subf %15, %90 : vector<8x128xf32>
      %92 = vector.broadcast %81 : f32 to vector<8x128xf32>
      %93 = arith.subf %18, %92 : vector<8x128xf32>
      %94 = vector.broadcast %83 : f32 to vector<8x128xf32>
      %95 = arith.mulf %91, %94 : vector<8x128xf32>
      %96 = vector.broadcast %85 : f32 to vector<8x128xf32>
      %97 = arith.mulf %93, %96 : vector<8x128xf32>
      %98 = arith.addf %95, %97 : vector<8x128xf32>
      %99 = vector.broadcast %83 : f32 to vector<8x128xf32>
      %100 = arith.mulf %93, %99 : vector<8x128xf32>
      %101 = vector.broadcast %85 : f32 to vector<8x128xf32>
      %102 = arith.mulf %91, %101 : vector<8x128xf32>
      %103 = arith.subf %100, %102 : vector<8x128xf32>
      %104 = vector.broadcast %87 : f32 to vector<8x128xf32>
      %105 = arith.mulf %104, %98 : vector<8x128xf32>
      %106 = arith.mulf %105, %98 : vector<8x128xf32>
      %107 = vector.broadcast %89 : f32 to vector<8x128xf32>
      %108 = arith.mulf %107, %103 : vector<8x128xf32>
      %109 = arith.mulf %108, %103 : vector<8x128xf32>
      %110 = arith.addf %106, %109 : vector<8x128xf32>
      %cst_31 = arith.constant 0.000000e+00 : f32
      %111 = vector.broadcast %cst_31 : f32 to vector<8x128xf32>
      %112 = arith.subf %111, %110 : vector<8x128xf32>
      %113 = math.exp %112 : vector<8x128xf32>
      %c1_32 = arith.constant 1 : index
      %114 = arith.index_cast %1 : i32 to index
      %c0_33 = arith.constant 0 : index
      %115 = vector.load %arg6[%c1_32, %114, %c0_33] : memref<2x8x128xf32, #tpu.memory_space<vmem>>, vector<1x8x128xf32>
      %116 = vector.shape_cast %115 : vector<1x8x128xf32> to vector<8x128xf32>
      %117 = vector.shape_cast %113 : vector<8x128xf32> to vector<1x8x128xf32>
      tpu.vector_store %arg6[%c1_32, %114, %c0_33], %117 {strides = array<i32>} : memref<2x8x128xf32, #tpu.memory_space<vmem>>, vector<1x8x128xf32>,
      %c1_34 = arith.constant 1 : index
      %c0_35 = arith.constant 0 : index
      %c0_36 = arith.constant 0 : index
      %118 = vector.load %arg7[%c1_34, %c0_35, %c0_36] : memref<2x8x128xf32, #tpu.memory_space<vmem>>, vector<1x8x128xf32>
      %119 = vector.shape_cast %118 : vector<1x8x128xf32> to vector<8x128xf32>
      %120 = arith.addf %119, %113 : vector<8x128xf32>
      %c1_37 = arith.constant 1 : index
      %c0_38 = arith.constant 0 : index
      %c0_39 = arith.constant 0 : index
      %121 = vector.load %arg7[%c1_37, %c0_38, %c0_39] : memref<2x8x128xf32, #tpu.memory_space<vmem>>, vector<1x8x128xf32>
      %122 = vector.shape_cast %121 : vector<1x8x128xf32> to vector<8x128xf32>
      %123 = vector.shape_cast %120 : vector<8x128xf32> to vector<1x8x128xf32>
      tpu.vector_store %arg7[%c1_37, %c0_38, %c0_39], %123 {strides = array<i32>} : memref<2x8x128xf32, #tpu.memory_space<vmem>>, vector<1x8x128xf32>,
    } else {
    }
    %c1_i32 = arith.constant 1 : i32
    %10 = arith.cmpi eq, %arg1, %c1_i32 : i32
    %11 = arith.extui %10 : i1 to i32
    %c0_i32_4 = arith.constant 0 : i32
    %12 = arith.cmpi ne, %11, %c0_i32_4 : i32
    scf.if %12 {
      %13 = arith.index_cast %arg0 : i32 to index
      %c1 = arith.constant 1 : index
      %14 = memref.load %arg3[%13, %c1] : memref<2x11xf32, #tpu.memory_space<smem>>
      %15 = arith.index_cast %arg0 : i32 to index
      %c2 = arith.constant 2 : index
      %16 = memref.load %arg3[%15, %c2] : memref<2x11xf32, #tpu.memory_space<smem>>
      %c0 = arith.constant 0 : index
      %c0_5 = arith.constant 0 : index
      %c0_6 = arith.constant 0 : index
      %17 = vector.load %arg7[%c0, %c0_5, %c0_6] : memref<2x8x128xf32, #tpu.memory_space<vmem>>, vector<1x8x128xf32>
      %18 = vector.shape_cast %17 : vector<1x8x128xf32> to vector<8x128xf32>
      %cst = arith.constant dense<0.000000e+00> : vector<8xf32>
      %19 = vector.multi_reduction <add>, %18, %cst [1] : vector<8x128xf32> to vector<8xf32>
      %20 = vector.shape_cast %19 : vector<8xf32> to vector<8x1xf32>
      %cst_7 = arith.constant dense<0.000000e+00> : vector<1xf32>
      %21 = vector.multi_reduction <add>, %20, %cst_7 [0] : vector<8x1xf32> to vector<1xf32>
      %22 = vector.shape_cast %21 : vector<1xf32> to vector<1x1xf32>
      %cst_8 = arith.constant 9.99999974E-5 : f32
      %23 = vector.broadcast %cst_8 : f32 to vector<1x1xf32>
      %24 = arith.addf %22, %23 : vector<1x1xf32>
      %cst_9 = arith.constant 1.000000e+00 : f32
      %25 = vector.broadcast %cst_9 : f32 to vector<1x1xf32>
      %26 = arith.divf %25, %24 : vector<1x1xf32>
      %27 = vector.broadcast %14 : f32 to vector<1x1xf32>
      %28 = arith.mulf %27, %22 : vector<1x1xf32>
      %29 = arith.mulf %28, %26 : vector<1x1xf32>
      %30 = arith.index_cast %arg0 : i32 to index
      %c9 = arith.constant 9 : index
      %31 = memref.load %arg3[%30, %c9] : memref<2x11xf32, #tpu.memory_space<smem>>
      %32 = arith.index_cast %arg0 : i32 to index
      %c10 = arith.constant 10 : index
      %33 = memref.load %arg3[%32, %c10] : memref<2x11xf32, #tpu.memory_space<smem>>
      %c1_10 = arith.constant 1 : index
      %c0_11 = arith.constant 0 : index
      %c0_12 = arith.constant 0 : index
      %34 = vector.load %arg7[%c1_10, %c0_11, %c0_12] : memref<2x8x128xf32, #tpu.memory_space<vmem>>, vector<1x8x128xf32>
      %35 = vector.shape_cast %34 : vector<1x8x128xf32> to vector<8x128xf32>
      %cst_13 = arith.constant dense<0.000000e+00> : vector<8xf32>
      %36 = vector.multi_reduction <add>, %35, %cst_13 [1] : vector<8x128xf32> to vector<8xf32>
      %37 = vector.shape_cast %36 : vector<8xf32> to vector<8x1xf32>
      %cst_14 = arith.constant dense<0.000000e+00> : vector<1xf32>
      %38 = vector.multi_reduction <add>, %37, %cst_14 [0] : vector<8x1xf32> to vector<1xf32>
      %39 = vector.shape_cast %38 : vector<1xf32> to vector<1x1xf32>
      %40 = vector.broadcast %33 : f32 to vector<1x1xf32>
      %41 = arith.mulf %40, %39 : vector<1x1xf32>
      %cst_15 = arith.constant 9.99999974E-5 : f32
      %42 = vector.broadcast %cst_15 : f32 to vector<1x1xf32>
      %43 = arith.addf %41, %42 : vector<1x1xf32>
      %cst_16 = arith.constant 1.000000e+00 : f32
      %44 = vector.broadcast %cst_16 : f32 to vector<1x1xf32>
      %45 = arith.divf %44, %43 : vector<1x1xf32>
      %46 = vector.broadcast %31 : f32 to vector<1x1xf32>
      %47 = arith.mulf %46, %41 : vector<1x1xf32>
      %48 = arith.mulf %47, %45 : vector<1x1xf32>
      %49 = arith.addf %29, %48 : vector<1x1xf32>
      %50 = vector.broadcast %33 : f32 to vector<1x1xf32>
      %51 = arith.mulf %50, %45 : vector<1x1xf32>
      %52 = vector.broadcast %31 : f32 to vector<1x1xf32>
      %53 = arith.mulf %52, %51 : vector<1x1xf32>
      %cst_17 = arith.constant 9.99999974E-5 : f32
      %54 = vector.broadcast %cst_17 : f32 to vector<1x1xf32>
      %55 = arith.addf %49, %54 : vector<1x1xf32>
      %cst_18 = arith.constant 1.000000e+00 : f32
      %56 = vector.broadcast %cst_18 : f32 to vector<1x1xf32>
      %57 = arith.divf %56, %55 : vector<1x1xf32>
      %58 = vector.broadcast %14 : f32 to vector<1x1xf32>
      %59 = arith.mulf %58, %26 : vector<1x1xf32>
      %60 = vector.broadcast %16 : f32 to vector<1x1xf32>
      %61 = arith.mulf %60, %59 : vector<1x1xf32>
      %62 = arith.mulf %61, %57 : vector<1x1xf32>
      %c0_19 = arith.constant 0 : index
      %63 = arith.index_cast %1 : i32 to index
      %c0_20 = arith.constant 0 : index
      %64 = vector.load %arg6[%c0_19, %63, %c0_20] : memref<2x8x128xf32, #tpu.memory_space<vmem>>, vector<1x8x128xf32>
      %65 = vector.shape_cast %64 : vector<1x8x128xf32> to vector<8x128xf32>
      %66 = vector.broadcast %62 : vector<1x1xf32> to vector<8x128xf32>
      %67 = arith.mulf %66, %65 : vector<8x128xf32>
      %68 = vector.broadcast %16 : f32 to vector<1x1xf32>
      %69 = arith.mulf %68, %53 : vector<1x1xf32>
      %70 = arith.mulf %69, %57 : vector<1x1xf32>
      %c1_21 = arith.constant 1 : index
      %71 = arith.index_cast %1 : i32 to index
      %c0_22 = arith.constant 0 : index
      %72 = vector.load %arg6[%c1_21, %71, %c0_22] : memref<2x8x128xf32, #tpu.memory_space<vmem>>, vector<1x8x128xf32>
      %73 = vector.shape_cast %72 : vector<1x8x128xf32> to vector<8x128xf32>
      %74 = vector.broadcast %70 : vector<1x1xf32> to vector<8x128xf32>
      %75 = arith.mulf %74, %73 : vector<8x128xf32>
      %76 = arith.addf %67, %75 : vector<8x128xf32>
      %c0_23 = arith.constant 0 : index
      %c0_24 = arith.constant 0 : index
      %c0_25 = arith.constant 0 : index
      %77 = vector.load %arg5[%c0_23, %c0_24, %c0_25] : memref<1x8x128xf32, #tpu.memory_space<vmem>>, vector<1x8x128xf32>
      %78 = vector.shape_cast %77 : vector<1x8x128xf32> to vector<8x128xf32>
      %79 = vector.shape_cast %76 : vector<8x128xf32> to vector<1x8x128xf32>
      tpu.vector_store %arg5[%c0_23, %c0_24, %c0_25], %79 {strides = array<i32>} : memref<1x8x128xf32, #tpu.memory_space<vmem>>, vector<1x8x128xf32>,
    } else {
    }
    return
  }
  func.func @transform_0(%arg0: i32, %arg1: i32, %arg2: i32, %arg3: memref<2x11xf32, #tpu.memory_space<smem>>) -> (i32, i32, i32) {
    %c0_i32 = arith.constant 0 : i32
    %c0_i32_0 = arith.constant 0 : i32
    %c0_i32_1 = arith.constant 0 : i32
    %c0_i32_2 = arith.constant 0 : i32
    return %c0_i32, %c0_i32_0, %c0_i32_1 : i32, i32, i32
  }
  func.func @transform_1(%arg0: i32, %arg1: i32, %arg2: i32, %arg3: memref<2x11xf32, #tpu.memory_space<smem>>) -> (i32, i32, i32) {
    %0 = arith.muli %arg2, %arg1 : i32
    %c0_i32 = arith.constant 0 : i32
    %c0_i32_0 = arith.constant 0 : i32
    return %arg0, %0, %c0_i32 : i32, i32, i32
  }
}

</mosaic_0001>

<bundles_post_ra>
// kernel: _forward_impl.1
= control target key start
LH: loop header
LB: loop body
LE: loop exit
PB: predicated region body
PF: predicated region fallthrough
CT: control target
= control target key end

     0   :  { %s610_s0 = inlined_call_operand.vmem [shape: f32[2,11], index: 0, kind: input, shape index: {}]   ;;  %s611_s1 = inlined_call_operand.vmem [shape: f32[3,8,128], index: 1, kind: input, shape index: {}]   ;;  %s612_s2 = inlined_call_operand.vmem [shape: f32[2,8,128], index: 2, kind: output, shape index: {}]  }
   0x1   :  { %s7_s11 = sshll.u32 %s610_s0, 4  ;;  %s8_s11 = int_to_ptr.vmem [resolvable:$true] %s7_s11 }
   0x2   :  { %s456_s12 = scalar_lea.vmem %s8_s11, 32  ;;  %p461_p1 = scmp.lt.s32.totalorder %s8_s11, %s8_s11 }
   0x3   :  { %p457_p0 = scmp.ne.s32.totalorder %s8_s11, %s456_s12  ;;  %p462_p2 = scmp.lt.s32.totalorder %s456_s12, %s456_s12 }
   0x5   :  { %p463_p3 = por %p462_p2, %p461_p1 }
   0x7   :  { %p464_p4 = pnand %p463_p3, %p457_p0 }
   0x9   :  { %467 = shalt.err (!%p464_p4)  }
   0xa   :  { %s510_s13 = smov [#allocation5]  }
   0xb   :  { %10 = dma.vmem_to_smem %s8_s11, 32, %s510_s13, [#allocation4] }
   0xc   :  { %488 = dma.done.wait [#allocation4], 32 }
   0xd   :  { %489 = vsyncadd [#allocation4], 4294967264 }
   0xe   :  { %12 = sfence }
   0xf   :  { %s530_s14 = smov 0   ;;  %s532_s15 = smov 0  }
  0x10   :  { %s534_s16 = smov 0   ;;  %s536_s0 = smov 0  }
  0x11   :  { %s538_s17 = smov 0  }
  0x12 LB: > { %s33_s18 = sadd.s32 1, %s500_s16  ;;  %s37_s19 = sadd.s32 1, %s504_s0  ;;  %s508_s17 = sphi %s538_s17, %s18_s17   ;;  %s504_s0 = sphi %s536_s0, %s616_s0   ;;  %s500_s16 = sphi %s534_s16, %s615_s16   ;;  %s496_s15 = sphi %s532_s15, %s614_s15   ;;  %s492_s14 = sphi %s530_s14, %s613_s14  }
  0x13   : > { %p35_p5 = scmp.ge.s32.totalorder %s33_s18, 2  ;;  %p388_p6 = scmp.ge.s32.totalorder %s508_s17, 1 }
  0x14   : > { %p107_p7 = scmp.lt.s32.totalorder %s508_s17, 5 }
  0x15   : > { %s618_s18 = smov (%p35_p5, %s33_s18), 0  ;;  %s620_s19 = smov (!%p35_p5, %s37_s19), %s504_s0 }
  0x16   : > { %p108_p8 = pnand %p388_p6, %p107_p7  ;;  %p39_p9 = scmp.ge.s32.totalorder %s620_s19, 2 }
  0x17   : > { %p126_p10 = scmp.lt.s32.totalorder (!%p108_p8), %s496_s15, 1  ;;  %p135_p11 = scmp.eq.s32.totalorder (!%p108_p8), %s492_s14, 0 }
  0x18   : > { %s622_s19 = smov (%p39_p9, %s620_s19), 0  ;;  %111 = sbr.rel (%p108_p8) target bundleno = 305 (0x131), region = 24 }
  0x1f   : > { %s127_s20 = scalar_select %p126_p10, %s496_s15, 1 }
  0x20   : > { %140 = sbr.rel (!%p135_p11) target bundleno = 39 (0x27), region = 28  ;;  %v511_v0 = vmov (%p135_p11), 0.0  }
  0x21   : > { %s389_s21 = sshll.u32 %s127_s20, 3  ;;  %141 = vst [vmem:[#allocation3] sm:$0xff] (%p135_p11), %v511_v0  ;;  %142 = vst [vmem:[#allocation3 + $0x8] sm:$0xff] (%p135_p11), %v511_v0 }
  0x22   : > { %s570_s24 = scalar_lea.vmem %s612_s2, %s389_s21 }
  0x27 PF: > { %p391_p12 = scmp.ne.s32.totalorder %s492_s14, 0 }
  0x28   : > { %s394_s25 = sshll.u32 (!%p391_p12), %s496_s15, 7  ;;  %v393_v1 = vld [vmem:[%s611_s1 + $0x10] sm:$0xff] (!%p391_p12)  ;;  %v147_v2 = vld [vmem:[%s611_s1] sm:$0xff] (!%p391_p12)  ;;  %v392_v4 = vld [vmem:[%s611_s1 + $0x8] sm:$0xff] (!%p391_p12) }
  0x29   : > { %145 = sbr.rel (%p391_p12) target bundleno = 107 (0x6b), region = 32  ;;  %s155_s26 = sld [smem:[#allocation5 + %s394_s25]] (!%p391_p12)  ;;  %v228_v38 = vld [vmem:[#allocation3 + $0x8] sm:$0xff] (!%p391_p12)  ;;  %v188_v56 = vld [vmem:[#allocation3] sm:$0xff] (!%p391_p12) }
  0x2a   : > { %s191_s27 = sadd.s32 (!%p391_p12), 3, %s394_s25  ;;  %s193_s29 = sadd.s32 (!%p391_p12), 4, %s394_s25 }
  0x2b   : > { %s192_s28 = sld [smem:[#allocation5 + %s191_s27]] (!%p391_p12)  ;;  %s195_s3 = sadd.s32 (!%p391_p12), 5, %s394_s25 }
  0x2c   : > { %s194_s30 = sld [smem:[#allocation5 + %s193_s29]] (!%p391_p12)  ;;  %s197_s5 = sadd.s32 (!%p391_p12), 6, %s394_s25 }
  0x2d   : > { %s196_s4 = sld [smem:[#allocation5 + %s195_s3]] (!%p391_p12)  ;;  %s199_s9 = sadd.s32 (!%p391_p12), 7, %s394_s25 }
  0x2e   : > { %s198_s8 = sld [smem:[#allocation5 + %s197_s5]] (!%p391_p12)  ;;  %s201_s13 = sadd.s32 (!%p391_p12), 8, %s394_s25 }
  0x2f   : > { %s200_s12 = sld [smem:[#allocation5 + %s199_s9]] (!%p391_p12)  ;;  %v156_v3 = vstv (!%p391_p12), %s155_s26 }
  0x30   : > { %s202_s22 = sld [smem:[#allocation5 + %s201_s13]]  ;;  %v157_v5 = vsub.f32 %v156_v3, %v393_v1 }
  0x31   : > { %v203_v6 = vstv %s192_s28 }
  0x32   : > { %v204_v7 = vsub.f32 %v147_v2, %v203_v6  ;;  %v205_v8 = vstv %s194_s30  ;;  %v158_v9 = vmul.f32 5.656854, %v157_v5 }
  0x33   : > { %v206_v10 = vsub.f32 %v392_v4, %v205_v8  ;;  %v207_v11 = vstv %s196_s4 }
  0x34   : > { %v208_v12 = vmul.f32 %v207_v11, %v204_v7  ;;  %v209_v13 = vstv %s198_s8  ;;  %v159_v14 = vand.u32 2147483647, %v158_v9  ;;  %vm181_vm0 = vcmp.ge.f32.partialorder %v158_v9, 0.0 }
  0x35   : > { %v210_v15 = vmul.f32 %v209_v13, %v206_v10  ;;  %v212_v16 = vmul.f32 %v207_v11, %v206_v10  ;;  %v213_v17 = vmul.f32 %v209_v13, %v204_v7  ;;  %v215_v18 = vstv %s200_s12 }
  0x36   : > { %v160_v19 = vmul.f32 0.3275911, %v159_v14  ;;  %v218_v21 = vstv %s202_s22  ;;  %v175_v32 = vsub.f32 0.0, %v159_v14 }
  0x37   : > { %v211_v20 = vadd.f32 %v210_v15, %v208_v12  ;;  %v214_v22 = vsub.f32 %v212_v16, %v213_v17 }
  0x38   : > { %v161_v23 = vadd.f32 1.0, %v160_v19  ;;  %v176_v35 = vmul.f32 %v175_v32, %v159_v14 }
  0x39   : > { %v216_v24 = vmul.f32 %v215_v18, %v211_v20  ;;  %v219_v25 = vmul.f32 %v218_v21, %v214_v22 }
  0x3a   : > { %444 = vrcp.f32 %v161_v23  ;;  %v177_v39 = vmul.f32 1.442695, %v176_v35 }
  0x3b   : > { %v217_v26 = vmul.f32 %v216_v24, %v211_v20  ;;  %v220_v27 = vmul.f32 %v219_v25, %v214_v22 }
  0x3d   : > { %v221_v28 = vadd.f32 %v220_v27, %v217_v26 }
  0x3f   : > { %v222_v29 = vsub.f32 0.0, %v221_v28 }
  0x41   : > { %v223_v30 = vmul.f32 1.442695, %v222_v29 }
  0x43   : > { %446 = vpow2.f32 %v223_v30 }
  0x44   : > { %v445_v31 = vpop.eup %444  ;;  %448 = vpow2.f32 %v177_v39 }
  0x45   : > { %v163_v33 = vmul.f32 %v445_v31, %v161_v23 }
  0x47   : > { %v164_v34 = vsub.f32 2.0, %v163_v33 }
  0x49   : > { %v165_v36 = vmul.f32 %v445_v31, %v164_v34 }
  0x4b   : > { %v166_v37 = vmul.f32 1.0614054, %v165_v36 }
  0x4d   : > { %v447_v40 = vpop.eup %446  ;;  %v167_v41 = vadd.f32 -1.4531521, %v166_v37 }
  0x4e   : > { %395 = vst [vmem:[#allocation2 + $0x8] sm:$0xff] %v447_v40  ;;  %v229_v42 = vadd.f32 %v447_v40, %v228_v38  ;;  %v449_v49 = vpop.eup %448 }
  0x4f   : > { %v168_v43 = vmul.f32 %v167_v41, %v165_v36 }
  0x50   : > { %230 = vst [vmem:[#allocation3 + $0x8] sm:$0xff] %v229_v42 }
  0x51   : > { %v169_v44 = vadd.f32 1.4214138, %v168_v43 }
  0x53   : > { %v170_v45 = vmul.f32 %v169_v44, %v165_v36 }
  0x55   : > { %v171_v46 = vadd.f32 -0.28449672, %v170_v45 }
  0x57   : > { %v172_v47 = vmul.f32 %v171_v46, %v165_v36 }
  0x59   : > { %v173_v48 = vadd.f32 0.2548296, %v172_v47 }
  0x5b   : > { %v174_v50 = vmul.f32 %v173_v48, %v165_v36 }
  0x5d   : > { %v179_v51 = vmul.f32 %v449_v49, %v174_v50 }
  0x5f   : > { %v180_v52 = vsub.f32 1.0, %v179_v51 }
  0x61   : > { %v182_v53 = vsub.f32 0.0, %v180_v52 }
  0x63   : > { %v183_v54 = vsel %vm181_vm0, %v180_v52, %v182_v53 }
  0x64   : > { %v184_v55 = vadd.f32 1.0, %v183_v54 }
  0x66   : > { %v185_v57 = vmul.f32 0.5, %v184_v55 }
  0x68   : > { %187 = vst [vmem:[#allocation2] sm:$0xff] %v185_v57  ;;  %v189_v58 = vadd.f32 %v188_v56, %v185_v57 }
  0x6a   : > { %190 = vst [vmem:[#allocation3] sm:$0xff] %v189_v58 }
  0x6b PF: > { %p396_p13 = scmp.ne.s32.totalorder %s492_s14, 1 }
  0x6c   : > { %v260_v59 = vld [vmem:[#allocation3 + $0x8] sm:$0xff] (!%p396_p13)  ;;  %s585_s23 = sshll.u32 (!%p396_p13), %s496_s15, 7  ;;  %v398_v33 = vld [vmem:[#allocation2 + $0x8] sm:$0xff] (!%p396_p13) }
  0x6d   : > { %234 = sbr.rel (%p396_p13) target bundleno = 305 (0x131), region = 36  ;;  %261 = vadd.xlane.f32.xlu0 (!%p396_p13), %v260_v59  ;;  %s257_s25 = sadd.s32 (!%p396_p13), 10, %s585_s23 }
  0x6e   : > { %s588_s26 = sld [smem:[#allocation5 + %s257_s25]] (!%p396_p13)  ;;  %s255_s14 = sadd.s32 (!%p396_p13), 9, %s585_s23 }
  0x6f   : > { %s236_s15 = sadd.s32 (!%p396_p13), 1, %s585_s23  ;;  %s256_s27 = sld [smem:[#allocation5 + %s255_s14]] (!%p396_p13)  ;;  %v288_v32 = vld [vmem:[#allocation2] sm:$0xff] (!%p396_p13) }
  0x70   : > { %s237_s28 = sld [smem:[#allocation5 + %s236_s15]] (!%p396_p13)  ;;  %s238_s29 = sadd.s32 (!%p396_p13), 2, %s585_s23 }
  0x71   : > { %v240_v60 = vld [vmem:[#allocation3] sm:$0xff] (!%p396_p13)  ;;  %s239_s30 = sld [smem:[#allocation5 + %s238_s29]] (!%p396_p13) }
  0x72   : > { %241 = vadd.xlane.f32.xlu0 (!%p396_p13), %v240_v60 }
  0x74   : > { %v269_v7 = vstv %s588_s26 }
  0x75   : > { %v274_v15 = vstv %s256_s27 }
  0x76   : > { %v252_v16 = vstv %s237_s28 }
  0x77   : > { %v284_v28 = vstv %s239_s30 }
  0xfa   : > { %v262_v61 = vpop.xlane.xlu0 %261 }
  0xfb   : > { %v263_v62 = vrot.slane %v262_v61, 4 }
  0xfd   : > { %v264_v63 = vadd.f32 %v263_v62, %v262_v61 }
  0xff   : > { %v242_v0 = vpop.xlane.xlu0 %241  ;;  %v265_v1 = vrot.slane %v264_v63, 2 }
 0x100   : > { %v243_v2 = vrot.slane %v242_v0, 4 }
 0x101   : > { %v266_v3 = vadd.f32 %v265_v1, %v264_v63 }
 0x102   : > { %v244_v4 = vadd.f32 %v243_v2, %v242_v0 }
 0x103   : > { %v267_v5 = vrot.slane %v266_v3, 1 }
 0x104   : > { %v245_v6 = vrot.slane %v244_v4, 2 }
 0x105   : > { %v268_v8 = vadd.f32 %v267_v5, %v266_v3 }
 0x106   : > { %v246_v9 = vadd.f32 %v245_v6, %v244_v4 }
 0x107   : > { %v270_v10 = vmul.f32 %v269_v7, %v268_v8 }
 0x108   : > { %v247_v11 = vrot.slane %v246_v9, 1 }
 0x109   : > { %v271_v12 = vadd.f32 0.0001, %v270_v10  ;;  %v275_v18 = vmul.f32 %v274_v15, %v270_v10 }
 0x10a   : > { %v248_v13 = vadd.f32 %v247_v11, %v246_v9 }
 0x10b   : > { %450 = vrcp.f32 %v271_v12 }
 0x10c   : > { %v249_v14 = vadd.f32 0.0001, %v248_v13  ;;  %v253_v19 = vmul.f32 %v252_v16, %v248_v13 }
 0x10e   : > { %452 = vrcp.f32 %v249_v14 }
 0x115   : > { %v451_v17 = vpop.eup %450 }
 0x116   : > { %v276_v21 = vmul.f32 %v451_v17, %v275_v18  ;;  %v278_v25 = vmul.f32 %v451_v17, %v269_v7 }
 0x118   : > { %v453_v20 = vpop.eup %452  ;;  %v279_v26 = vmul.f32 %v278_v25, %v274_v15 }
 0x119   : > { %v254_v22 = vmul.f32 %v453_v20, %v253_v19  ;;  %v283_v27 = vmul.f32 %v453_v20, %v252_v16 }
 0x11a   : > { %v290_v30 = vmul.f32 %v284_v28, %v279_v26 }
 0x11b   : > { %v277_v23 = vadd.f32 %v276_v21, %v254_v22  ;;  %v285_v29 = vmul.f32 %v284_v28, %v283_v27 }
 0x11d   : > { %v280_v24 = vadd.f32 0.0001, %v277_v23 }
 0x11f   : > { %454 = vrcp.f32 %v280_v24 }
 0x129   : > { %v455_v31 = vpop.eup %454 }
 0x12a   : > { %v286_v34 = vmul.f32 %v455_v31, %v285_v29  ;;  %v291_v35 = vmul.f32 %v455_v31, %v290_v30 }
 0x12c   : > { %v289_v36 = vmul.f32 %v288_v32, %v286_v34  ;;  %v295_v37 = vmul.f32 %v398_v33, %v291_v35 }
 0x12e   : > { %v296_v38 = vadd.f32 %v295_v37, %v289_v36 }
 0x130   : > { %297 = vst [vmem:[%s570_s24] sm:$0xff] %v296_v38 }
 0x131 PF: > { %s18_s17 = sadd.s32 1, %s508_s17   ;;  %s613_s14 = smov %s500_s16 }
 0x132   : > { %p15_p0 = scmp.ge.s32.totalorder %s18_s17, 6   ;;  %s614_s15 = smov %s504_s0 }
 0x133   : > { %s615_s16 = smov %s618_s18  ;;  %s616_s0 = smov %s622_s19 }
 0x134   :  { %17 = sbr.rel (!%p15_p0) target bundleno = 18 (0x12), region = 72 }

</bundles_post_ra>
